<compile_context>
chip_gen: v7x
topology: tpu7x:2x2x1
jax: 0.10.0
libtpu: 0.0.40
codegen_flags: <defaults>
</compile_context>

<pallas_src>
import math
from functools import partial

import jax
import jax.numpy as jnp
from jax.experimental import pallas as pl
from jax.experimental.pallas import tpu as pltpu


# -----------------------------------------------------------------------------
# Kernel: one (tm, tn) output tile, full-K contraction in a single MXU call.
# -----------------------------------------------------------------------------
def _linear_kernel(x_ref, w_ref, b_ref, o_ref):
    """
    x_ref : (tm, K)   activation tile
    w_ref : (tn, K)   weight tile in nn.Linear layout (out_features, in_features)
    b_ref : (1, tn)   bias tile
    o_ref : (tm, tn)  output tile (written exactly once)
    """
    acc = jax.lax.dot_general(
        x_ref[...],
        w_ref[...],
        dimension_numbers=(((1,), (1,)), ((), ())),  # contract K of x with K of W
        preferred_element_type=jnp.float32,
    )
    o_ref[...] = (acc + b_ref[...].astype(jnp.float32)).astype(o_ref.dtype)


# -----------------------------------------------------------------------------
# Helpers (all trace-time Python; shapes are static under jit)
# -----------------------------------------------------------------------------
def _sublane_granule(dtype) -> int:
    # native (sublane, lane) tiles: (8,128) f32, (16,128) bf16, (32,128) 8-bit
    return {4: 8, 2: 16, 1: 32}.get(jnp.dtype(dtype).itemsize, 8)


def _pick_tile(dim: int, target: int, granule: int) -> int:
    """Largest tile <= target that is a multiple of `granule`; if the dim itself
    is smaller than one granule, use the full dim (legal per the (8,128) rule)."""
    if dim <= granule:
        return dim
    t = min(target, dim)
    return max(granule, (t // granule) * granule)


def _device_kind() -> str:
    try:
        return jax.devices()[0].device_kind.lower()
    except Exception:
        return ""


def _vmem_budget_bytes(kind: str) -> int:
    # Per-TC VMEM: 128 MiB on v5e/v6e, 64 MiB on v7x. Leave headroom for
    # compiler-internal scratch; unknown chips get the conservative budget.
    if "v5" in kind or "v6" in kind:
        return 96 << 20
    return 44 << 20


def _vmem_phys_bytes(kind: str) -> int:
    if "v5" in kind or "v6" in kind:
        return 128 << 20
    return 64 << 20


# -----------------------------------------------------------------------------
# Wrapper
# -----------------------------------------------------------------------------
@partial(jax.jit, static_argnames=("tm", "tn"))
def linear_forward(x, weight, bias=None, *, tm=None, tn=None):
    """F.linear(x, weight, bias): y = x @ W^T + b, arbitrary leading batch dims.

    weight : (out_features, in_features) consumed in nn.Linear layout
             (no per-call transpose / pad of the parameter tensors).
    """
    out_features, in_features = weight.shape
    assert x.shape[-1] == in_features

    lead_shape = x.shape[:-1]
    M = math.prod(lead_shape) if lead_shape else 1
    K = in_features
    N = out_features

    dtype = x.dtype
    in_bytes = jnp.dtype(dtype).itemsize
    out_bytes = in_bytes
    sub = _sublane_granule(dtype)

    kind = _device_kind()
    budget = _vmem_budget_bytes(kind)

    # ---- tile targets: regime-dependent -------------------------------------
    if tm is None:
        tm = M if M <= 256 else 512        # small-M: one row tile; large-M: 512
    if tn is None:
        tn = 1024 if M <= 256 else 512     # small-M is weight-BW bound -> wide tn

    tm = _pick_tile(M, tm, sub)            # dtype-aware sublane alignment
    tn = _pick_tile(N, tn, 128)            # lane-dense output stores

    # ---- clamp tiles to the per-generation VMEM budget -----------------------
    def footprint(tm_, tn_):
        # double-buffered inputs + double-buffered output + f32 acc temp
        return (2 * (tm_ * K + tn_ * K + tn_) * in_bytes
                + 2 * tm_ * tn_ * out_bytes
                + tm_ * tn_ * 4)

    while footprint(tm, tn) > budget:
        if tn >= tm and tn > 128:
            tn = max(128, ((tn // 2) // 128) * 128)
        elif tm > sub:
            tm = max(sub, ((tm // 2) // sub) * sub)
        else:
            break

    gm = pl.cdiv(M, tm)
    gn = pl.cdiv(N, tn)

    # ---- v7x: make sure a 'parallel' axis has >= 2 points (2 TCs / chip) -----
    if gm * gn == 1:
        if N >= 256 and tn >= 256:
            tn = max(128, ((tn // 2) // 128) * 128)
            gn = pl.cdiv(N, tn)
        elif M >= 2 * sub and tm >= 2 * sub:
            tm = max(sub, ((tm // 2) // sub) * sub)
            gm = pl.cdiv(M, tm)

    # ---- grid order: revisit whichever operand costs less to re-stream -------
    #   (gm, gn): x streamed once, the whole weight re-read gm times
    #   (gn, gm): weight streamed once, the whole x re-read gn times
    bytes_w_revisit = (M * K + gm * N * K) * in_bytes
    bytes_x_revisit = (N * K + gn * M * K) * in_bytes
    if bytes_w_revisit <= bytes_x_revisit:
        grid = (gm, gn)
        x_map = lambda i, j: (i, 0)
        w_map = lambda i, j: (j, 0)
        b_map = lambda i, j: (0, j)
        o_map = lambda i, j: (i, j)
    else:
        grid = (gn, gm)
        x_map = lambda j, i: (i, 0)
        w_map = lambda j, i: (j, 0)
        b_map = lambda j, i: (0, j)
        o_map = lambda j, i: (i, j)

    # ---- operands (no padding: ragged edges handled by the cdiv grid) --------
    x2d = x.reshape(M, K)
    if bias is None:
        b2d = jnp.zeros((1, N), dtype=dtype)
    else:
        b2d = bias.reshape(1, N).astype(dtype)

    vmem_limit = min(
        _vmem_phys_bytes(kind),
        max(32 << 20, int(footprint(tm, tn) * 1.25) + (2 << 20)),
    )

    out2d = pl.pallas_call(
        _linear_kernel,
        out_shape=jax.ShapeDtypeStruct((M, N), dtype),
        grid_spec=pltpu.PrefetchScalarGridSpec(
            num_scalar_prefetch=0,
            grid=grid,
            in_specs=[
                pl.BlockSpec((tm, K), x_map),   # activation tile, full K
                pl.BlockSpec((tn, K), w_map),   # weight tile (out, in), full K
                pl.BlockSpec((1, tn), b_map),   # bias tile
            ],
            out_specs=pl.BlockSpec((tm, tn), o_map),
        ),
        compiler_params=pltpu.CompilerParams(
            dimension_semantics=("parallel", "parallel"),
            vmem_limit_bytes=vmem_limit,
        ),
        cost_estimate=pl.CostEstimate(
            flops=2 * M * N * K,
            transcendentals=0,
            bytes_accessed=(M * K + N * K + N + M * N) * in_bytes,
        ),
    )(x2d, weight, b2d)

    return out2d.reshape(*lead_shape, N)


def init_linear_params(key, in_features, out_features, dtype=jnp.float32):
    """Deterministic init mirroring nn.Linear.reset_parameters (kaiming_uniform
    with a=sqrt(5) reduces to U(-1/sqrt(fan_in), 1/sqrt(fan_in)))."""
    kw, kb = jax.random.split(key)
    bound = 1.0 / math.sqrt(in_features)
    weight = jax.random.uniform(
        kw, (out_features, in_features), dtype=dtype, minval=-bound, maxval=bound
    )
    bias = jax.random.uniform(
        kb, (out_features,), dtype=dtype, minval=-bound, maxval=bound
    )
    return weight, bias


if __name__ == "__main__":
    key = jax.random.PRNGKey(0)
    k_x, k_p = jax.random.split(key)

    batch, seq, in_features, out_features = 2, 8, 32, 64
    x = jax.random.normal(k_x, (batch, seq, in_features), dtype=jnp.float32)
    weight, bias = init_linear_params(k_p, in_features, out_features)

    y = linear_forward(x, weight, bias)
    y = jax.block_until_ready(y)

    # Same-(default)-precision pure-JAX reference: both the kernel and this
    # reference use the TPU's default f32 matmul lowering, so the tolerance is
    # apples-to-apples (addresses the precision concern from review).
    y_ref = (
        jax.lax.dot_general(
            x.reshape(-1, in_features),
            weight,
            dimension_numbers=(((1,), (1,)), ((), ())),
        )
        + bias
    ).reshape(batch, seq, out_features)

    assert y.shape == (batch, seq, out_features)
    err = float(jnp.max(jnp.abs(y - y_ref)))
    assert jnp.allclose(y, y_ref, atol=1e-4, rtol=1e-4), err

    print("KERNEL_OK")
</pallas_src>

<mosaic_0001>
module attributes {stable_mosaic.version = 11 : i64} {
  func.func @_linear_kernel(%arg0: i32, %arg1: i32, %arg2: memref<8x32xf32, #tpu.memory_space<vmem>>, %arg3: memref<64x32xf32, #tpu.memory_space<vmem>>, %arg4: memref<1x64xf32, #tpu.memory_space<vmem>>, %arg5: memref<8x64xf32, #tpu.memory_space<vmem>>) attributes {dimension_semantics = [#tpu.dimension_semantics<parallel>, #tpu.dimension_semantics<parallel>], iteration_bounds = array<i64: 1, 2>, scalar_prefetch = 0 : i64, scratch_operands = 0 : i64, tpu.core_type = #tpu.core_type<tc>, window_params = [{transform_indices = @transform_0, window_bounds = array<i64: 8, 32>}, {transform_indices = @transform_1, window_bounds = array<i64: 64, 32>}, {transform_indices = @transform_2, window_bounds = array<i64: 1, 64>}, {transform_indices = @transform_3, window_bounds = array<i64: 8, 64>}]} {
    %c0 = arith.constant 0 : index
    %c0_0 = arith.constant 0 : index
    %0 = vector.load %arg2[%c0, %c0_0] : memref<8x32xf32, #tpu.memory_space<vmem>>, vector<8x32xf32>
    %c0_1 = arith.constant 0 : index
    %c0_2 = arith.constant 0 : index
    %1 = vector.load %arg3[%c0_1, %c0_2] : memref<64x32xf32, #tpu.memory_space<vmem>>, vector<64x32xf32>
    %cst = arith.constant dense<0.000000e+00> : vector<8x64xf32>
    %2 = tpu.matmul %0, %1, %cst {dimension_numbers = #tpu.dot_dimension_numbers<[1], [1], [0], [0], [0, 0, 1, 0], [], []>} : vector<8x32xf32>, vector<64x32xf32>, vector<8x64xf32> -> vector<8x64xf32>
    %c0_3 = arith.constant 0 : index
    %c0_4 = arith.constant 0 : index
    %3 = vector.load %arg4[%c0_3, %c0_4] : memref<1x64xf32, #tpu.memory_space<vmem>>, vector<1x64xf32>
    %4 = vector.broadcast %3 : vector<1x64xf32> to vector<8x64xf32>
    %5 = arith.addf %2, %4 : vector<8x64xf32>
    %c0_5 = arith.constant 0 : index
    %c0_6 = arith.constant 0 : index
    %6 = vector.load %arg5[%c0_5, %c0_6] : memref<8x64xf32, #tpu.memory_space<vmem>>, vector<8x64xf32>
    tpu.vector_store %arg5[%c0_5, %c0_6], %5 {strides = array<i32>} : memref<8x64xf32, #tpu.memory_space<vmem>>, vector<8x64xf32>,
    return
  }
  func.func @transform_0(%arg0: i32, %arg1: i32) -> (i32, i32) {
    %c0_i32 = arith.constant 0 : i32
    %c0_i32_0 = arith.constant 0 : i32
    return %arg1, %c0_i32 : i32, i32
  }
  func.func @transform_1(%arg0: i32, %arg1: i32) -> (i32, i32) {
    %c0_i32 = arith.constant 0 : i32
    %c0_i32_0 = arith.constant 0 : i32
    return %arg0, %c0_i32 : i32, i32
  }
  func.func @transform_2(%arg0: i32, %arg1: i32) -> (i32, i32) {
    %c0_i32 = arith.constant 0 : i32
    %c0_i32_0 = arith.constant 0 : i32
    return %c0_i32, %arg0 : i32, i32
  }
  func.func @transform_3(%arg0: i32, %arg1: i32) -> (i32, i32) {
    %c0_i32 = arith.constant 0 : i32
    return %arg1, %arg0 : i32, i32
  }
}

</mosaic_0001>

<bundles_post_ra>
// kernel: linear_forward.1
= control target key start
LH: loop header
LB: loop body
LE: loop exit
PB: predicated region body
PF: predicated region fallthrough
CT: control target
= control target key end

     0   :  { %8 = vsyncpa [#allocation3], 0  ;;  %s825_s0 = inlined_call_operand.vmem [shape: f32[16,32], index: 0, kind: input, shape index: {}]   ;;  %s826_s1 = inlined_call_operand.vmem [shape: f32[64,32], index: 1, kind: input, shape index: {}]   ;;  %s827_s2 = inlined_call_operand.vmem [shape: f32[1,64], index: 2, kind: input, shape index: {}]   ;;  %s828_s3 = inlined_call_operand.hbm [shape: f32[16,64], index: 3, kind: output, shape index: {}]  }
   0x1   :  { %10 = vsyncpa [#allocation3 + $0x1], 0  ;;  %s671_s12 = smov 0   ;;  %s673_s13 = smov 0  }
   0x2   :  { %s675_s14 = smov 0   ;;  %s677_s15 = smov 0  }
   0x3   :  { %s679_s16 = smov 0   ;;  %s681_s17 = smov 0  }
   0x4 LB: > { %s442_s18 = sadd.s32 4294967295, %s645_s17   ;;  %s443_s19 = sadd.s32 4294967294, %s645_s17   ;;  %s645_s17 = sphi %s681_s17, %s16_s17   ;;  %s641_s16 = sphi %s679_s16, %s837_s16   ;;  %s637_s15 = sphi %s677_s15, %s836_s15   ;;  %s633_s14 = sphi %s675_s14, %s835_s14   ;;  %s629_s13 = sphi %s673_s13, %s834_s13   ;;  %s625_s12 = sphi %s671_s12, %s833_s12  }
   0x5   : > { %s25_s20 = sadd.s32 1, %s641_s16  ;;  %s115_s21 = sadd.s32 1, %s633_s14 }
   0x6   : > { %p26_p0 = scmp.ge.s32.totalorder %s25_s20, 2  ;;  %p125_p1 = scmp.ne.s32.totalorder %s633_s14, %s629_s13 }
   0x7   : > { %p126_p2 = scmp.eq.s32.totalorder %s442_s18, 1  ;;  %p131_p3 = scmp.ne.s32.totalorder %s629_s13, %s625_s12 }
   0x8   : > { %s839_s20 = smov (%p26_p0, %s25_s20), 0  ;;  %p132_p5 = scmp.eq.s32.totalorder %s443_s19, 1 }
   0x9   : > { %p711_p4 = por %p126_p2, %p125_p1  ;;  %s110_s23 = ssub.s32 %s641_s16, %s839_s20 }
   0xa   : > { %p448_p6 = scmp.ge.s32.totalorder %s645_s17, 1  ;;  %p113_p7 = scmp.eq.s32.totalorder %s110_s23, 0 }
   0xb   : > { %p718_p8 = por %p132_p5, %p131_p3  ;;  %p172_p9 = scmp.lt.s32.totalorder %s645_s17, 3 }
   0xc   : > { %s724_s25 = scalar_select %p113_p7, %s633_s14, %s115_s21  }
   0xd   : > { %p173_p10 = pnand %p448_p6, %p172_p9 }
   0xe   : > { %v217_v0 = vld [vmem:[%s826_s1] sm:$0xff] (!%p173_p10)  ;;  %v218_v1 = vld [vmem:[%s826_s1 + $0x8] sm:$0xff] (!%p173_p10)  ;;  %vm232_vm0 = vcmask (!%p173_p10), 261120   ;;  %v647_v2 = vmov (!%p173_p10), 0.0|0.0   ;;  %vm648_vm2 = vmmov (!%p173_p10), 0   ;;  %v649_v5 = vmov (!%p173_p10), 0.0  }
   0xf   : > { %176 = sbr.rel (%p173_p10) target bundleno = 276 (0x114), region = 32  ;;  %493 = vmatprep.subr.bf16.mxu0 (!%p173_p10), %v647_v2  ;;  %v494_v3 = vpack.c.bf16 (!%p173_p10), %v218_v1, %v217_v0  ;;  %vm734_vm1 = vmpackc.low (!%p173_p10), %vm232_vm0, %vm232_vm0  ;;  %490 = vmatprep.mubr.msk.f32.mxu0 (!%p173_p10), %vm648_vm2, %v649_v5  ;;  %v219_v6 = vld [vmem:[%s826_s1 + $0x10] sm:$0xff] (!%p173_p10)  ;;  %v220_v7 = vld [vmem:[%s826_s1 + $0x18] sm:$0xff] (!%p173_p10)  ;;  %p203_p11 = scmp.lt.s32.totalorder (!%p173_p10), %s637_s15, 1  ;;  %vm330_vm3 = vcmask (!%p173_p10), 523264  }
  0x10   : > { %v498_v8 = vpack.c.bf16 (!%p173_p10), %v220_v7, %v219_v6  ;;  %v221_v9 = vld [vmem:[%s826_s1 + $0x20] sm:$0xff] (!%p173_p10)  ;;  %v222_v10 = vld [vmem:[%s826_s1 + $0x28] sm:$0xff] (!%p173_p10)  ;;  %v223_v12 = vld [vmem:[%s826_s1 + $0x30] sm:$0xff] (!%p173_p10)  ;;  %s200_s30 = sand.u32 (!%p173_p10), 1, %s629_s13   ;;  %s462_s7 = sshll.u32 (!%p173_p10), %s637_s15, 7 }
  0x11   : > { %496 = vmatpush3.bf16.xpose.msk.msra.mxu0 (!%p173_p10), %vm734_vm1, %v494_v3  ;;  %v502_v11 = vpack.c.bf16 (!%p173_p10), %v222_v10, %v221_v9  ;;  %v224_v13 = vld [vmem:[%s826_s1 + $0x38] sm:$0xff] (!%p173_p10)  ;;  %s449_s4 = sshll.u32 (!%p173_p10), %s200_s30, 3  ;;  %v451_v16 = vld [vmem:[%s827_s2] ss:$0 sm:$0xff] (!%p173_p10)  ;;  %s778_s18 = scalar_lea.hbm (!%p173_p10), %s828_s3, %s462_s7 }
  0x12   : > { %497 = vmatprep.subr.bf16.mxu0 (!%p173_p10), %v647_v2  ;;  %v506_v14 = vpack.c.bf16 (!%p173_p10), %v224_v13, %v223_v12  ;;  %s202_s8 = scalar_lea.vmem (!%p173_p10), [#allocation2], %s449_s4  ;;  %s333_s19 = scalar_lea.sflag (!%p173_p10), [#allocation3], %s200_s30 }
  0x13   : > { %s347_s9 = sshll.u32 (!%p173_p10), %s202_s8, 4  ;;  %s780_s9 = int_to_ptr.vmem [resolvable:$true] %s347_s9 }
  0x14   : > { %s567_s21 = scalar_lea.vmem (!%p173_p10), %s780_s9, 128 }
  0x15   : > { %p568_p12 = scmp.ne.s32.totalorder (!%p173_p10), %s780_s9, %s567_s21 }
  0x16   : > { %s204_s23 = scalar_select %p203_p11, %s637_s15, 1 }
  0x17   : > { %p569_p13 = pnand %p568_p12, %p711_p4  ;;  %s650_s15 = smov [#allocation2]  }
  0x18   : > { %s450_s26 = sshll.u32 %s204_s23, 3  ;;  %s571_s23 = sshll.u32 %s650_s15, 4  ;;  %s572_s23 = int_to_ptr.vmem [resolvable:$false] %s571_s23 }
  0x19   : > { %500 = vmatpush3.bf16.xpose.msk.msra.mxu0 %vm734_vm1, %v498_v8  ;;  %s206_s29 = scalar_lea.vmem %s825_s0, %s450_s26  ;;  %p570_p0 = pneg %p569_p13 }
  0x1a   : > { %501 = vmatprep.subr.bf16.mxu0 %v647_v2  ;;  %v216_v15 = vld [vmem:[%s206_s29] sm:$0xff]  ;;  %s573_s26 = scalar_lea.vmem %s572_s23, 256  ;;  %p574_p1 = scmp.lt.s32.totalorder %s780_s9, %s572_s23 }
  0x1b   : > { %p575_p2 = scmp.lt.s32.totalorder %s573_s26, %s567_s21 }
  0x1d   : > { %p576_p3 = por %p575_p2, %p574_p1 }
  0x1f   : > { %p577_p5 = pnand %p576_p3, %p570_p0 }
  0x21   : > { %504 = vmatpush3.bf16.xpose.msk.msra.mxu0 %vm734_vm1, %v502_v11 }
  0x22   : > { %505 = vmatprep.subr.bf16.mxu0 %v647_v2 }
  0x29   : > { %508 = vmatpush3.bf16.xpose.msk.msra.mxu0 %vm734_vm1, %v506_v14 }
  0x30   : > { %491 = vmatmul.mubr.msk.f32.vlgmr.msra.gmra.mrb[0].mxu0 %vm232_vm0, %v216_v15 }
 0x103   : > { %v326_v17 = vpop.f32.mrb[0].mxu0 }
 0x104   : > { %v327_v18 = vadd.f32 %v451_v16, %v326_v17  ;;  %v492_v19 = vpop.f32.mrb[1].mxu0 }
 0x106   : > { %331 = vst.msk [vmem:[%s202_s8] sm:$0xff] %vm330_vm3, %v327_v18 }
 0x107   : > { %580 = shalt.err (!%p577_p5)
}
 0x108   : > { %s581_s27 = scalar_lea.hbm %s778_s18, 128  ;;  %s585_s30 = scalar_lea.hbm %s828_s3, 256 }
 0x109   : > { %p582_p6 = scmp.ne.s32.totalorder %s778_s18, %s581_s27  ;;  %p586_p10 = scmp.lt.u32.totalorder %s778_s18, %s828_s3 }
 0x10a   : > { %p587_p11 = scmp.lt.u32.totalorder %s585_s30, %s581_s27  ;;  %p589_p13 = scmp.lt.u32.totalorder %s581_s27, %s778_s18 }
 0x10b   : > { %p583_p7 = pnand %p582_p6, %p711_p4 }
 0x10c   : > { %p588_p12 = por %p587_p11, %p586_p10 }
 0x10d   : > { %p584_p9 = pneg %p583_p7 }
 0x10e   : > { %p590_p0 = por %p589_p13, %p588_p12 }
 0x110   : > { %p591_p1 = pnand %p590_p0, %p584_p9 }
 0x112   : > { %594 = shalt.err (!%p591_p1)
}
 0x113   : > { %509 = dma.vmem_to_hbm [thread:$0]  (%p711_p4), %s780_s9, 128, %s778_s18, %s333_s19  }
 0x114 PF: > { %p515_p2 = scmp.ge.s32.totalorder %s645_s17, 2  ;;  %s359_s6 = sand.u32 1, %s625_s12  }
 0x115   : > { %s360_s7 = scalar_lea.sflag [#allocation3], %s359_s6 }
 0x116   : > { %p512_p3 = pnand %p515_p2, %p718_p8 }
 0x118   : > { %620 = dma.done.wait (!%p512_p3), %s360_s7, 128  }
 0x119   : > { %622 = vsyncadd (!%p512_p3), %s360_s7, 4294967168  ;;  %s16_s17 = sadd.s32 1, %s645_s17   ;;  %s833_s12 = smov %s629_s13 }
 0x11a   : > { %p13_p5 = scmp.ge.s32.totalorder %s16_s17, 4   ;;  %s834_s13 = smov %s633_s14 }
 0x11b   : > { %s835_s14 = smov %s724_s25  ;;  %s836_s15 = smov %s641_s16 }
 0x11c   : > { %s837_s16 = smov %s839_s20  ;;  %15 = sbr.rel (!%p13_p5) target bundleno = 4 (0x4), region = 73 }
 0x123   :  { %365 = vsyncpa [#allocation3], 1 }
 0x124   :  { %367 = vsyncpa [#allocation3 + $0x1], 1 }

</bundles_post_ra>
